<compile_context>
chip_gen: v5e
topology: v5e:2x2
jax: 0.10.0
libtpu: 0.0.40
codegen_flags: <defaults>
</compile_context>

<pallas_src>
from dataclasses import dataclass

import jax
import jax.numpy as jnp
from jax.experimental import pallas as pl
from jax.experimental.pallas import tpu as pltpu


@dataclass
class ActionInfo:
    nclasses: int


def _round_up(v, m):
    return ((v + m - 1) // m) * m


def _vmem_budget_and_limit():
    """Per-generation VMEM budget for tile sizing + explicit scoped limit.

    ~65% of physical VMEM per TensorCore:
      v5e/v6e (128 MiB)  -> ~83 MiB budget
      v7x    (64 MiB/TC) -> ~41 MiB budget
    The limit handed to the compiler is the budget plus headroom (<= 85% phys).
    """
    try:
        cap = pltpu.get_tpu_info().vmem_capacity_bytes
    except Exception:
        cap = 64 * 1024 * 1024  # conservative fallback (v7x per-core physical)
    budget = min(int(cap * 0.65), 96 * 1024 * 1024)
    limit = min(int(cap * 0.85), budget + 8 * 1024 * 1024)
    return budget, limit


def _choose_tiles(M, D, n_pad, *, x_bytes, w_bytes, out_bytes, vmem_budget):
    """Pick (tm, tn, weight_resident).

    VMEM accounting:
      resident path : 1x (D, n_pad) weight (Buffered(1))
                      + 2x (tm, D) x tiles + 2x (tm, n_pad) out tiles
      tiled-N path  : 2x (D, tn) weight blocks (default double buffering)
                      + 2x (tm, D) x tiles + 2x (tm, tn) out tiles
    """
    m_cap = _round_up(max(M, 1), 16)        # never exceed the (rounded) problem
    tm_min = min(256, m_cap)                # bf16 packing -> multiples of 16

    def per_row(tn):
        return 2 * (D * x_bytes + tn * out_bytes)   # double-buffered x + out

    # --- Preferred: whole fused weight resident across the M sweep. ---
    w_resident = D * n_pad * w_bytes
    if w_resident + tm_min * per_row(n_pad) <= vmem_budget:
        tm = (vmem_budget - w_resident) // per_row(n_pad)
        tm = (tm // 16) * 16
        tm = max(tm_min, tm)
        tm = min(tm, 1024, m_cap)
        return tm, n_pad, True

    # --- Weight too large (e.g. huge D*H*C on v7x): tile the output columns. ---
    tn = n_pad
    while tn > 128 and 2 * D * tn * w_bytes + tm_min * per_row(tn) > vmem_budget:
        tn = _round_up(tn // 2, 128)
    avail = vmem_budget - 2 * D * tn * w_bytes
    if avail > 16 * per_row(tn):
        tm = max(16, (avail // per_row(tn)) // 16 * 16)
    else:
        tm = 16
    tm = min(tm, 1024, m_cap)
    # TODO(synk): if even tn=128 overflows the budget a K (n_embd) split with an
    # f32 accumulator would be needed; not expected for realistic n_embd.
    return tm, tn, False


def _resident_weight_spec(block_shape, index_map):
    """Constant-index weight block: one VMEM buffer is enough (default is 2)."""
    try:
        return pl.BlockSpec(block_shape, index_map, pipeline_mode=pl.Buffered(1))
    except TypeError:
        # Older JAX without pipeline_mode: fall back to default double buffering.
        return pl.BlockSpec(block_shape, index_map)


def _action_head_kernel(x_ref, w_ref, o_ref):
    # x_ref: (tm, D) in the caller's dtype; w_ref: (D, tn) compute dtype (bf16);
    # o_ref: (tm, tn) out dtype.  Cast x in-kernel (VPU) and accumulate in f32.
    x = x_ref[...].astype(w_ref.dtype)
    o_ref[...] = jnp.dot(
        x, w_ref[...], preferred_element_type=jnp.float32
    ).astype(o_ref.dtype)


def prepare_fused_weight(w_stacked, *, compute_dtype=jnp.bfloat16):
    """Build the fused weight ONCE (hoisted out of the forward path).

    w_stacked: (H, D, C) pre-transposed per-head weights (nn.Linear weight.T).
    Returns (w_fused (D, n_pad), H, C) with n_pad = round_up(H*C, 128); the
    padded columns are zero so all kernel stores stay lane-dense (unmasked vst).
    """
    H, D, C = w_stacked.shape
    n_out = H * C
    # NOTE: 256-alignment can give slightly better MXU tiling on v6e/v7x when
    # the extra columns are cheap; 128 keeps padded output bandwidth minimal.
    n_pad = _round_up(n_out, 128)
    w = jnp.transpose(w_stacked, (1, 0, 2)).reshape(D, n_out)
    if n_pad != n_out:
        w = jnp.pad(w, ((0, 0), (0, n_pad - n_out)))
    return w.astype(compute_dtype), H, C


def action_head_forward(x, w_fused, *, num_heads, nclasses,
                        out_dtype=jnp.float32):
    """x: (B, T, D) (any float dtype; cast to the weight dtype inside the kernel).
    w_fused: (D, n_pad) from prepare_fused_weight (built once at init time).

    Returns (B, T, H, C) if num_heads > 1 else (B, T, C), matching PyTorch.
    """
    B, T, D = x.shape
    Dw, n_pad = w_fused.shape
    assert D == Dw
    n_out = num_heads * nclasses
    assert n_out <= n_pad

    M = B * T
    x2d = x.reshape(M, D)  # zero-copy view; no wrapper cast / pad of x

    vmem_budget, vmem_limit = _vmem_budget_and_limit()
    tm, tn, resident = _choose_tiles(
        M, D, n_pad,
        x_bytes=x2d.dtype.itemsize,
        w_bytes=w_fused.dtype.itemsize,
        out_bytes=jnp.dtype(out_dtype).itemsize,
        vmem_budget=vmem_budget,
    )
    # v7x has 2 TensorCores: make sure the "parallel" M axis has >=2 steps when
    # there is enough work, otherwise one core idles.
    if M >= 1024 and pl.cdiv(M, tm) < 2:
        tm = _round_up(pl.cdiv(M, 2), 16)

    gm = pl.cdiv(M, tm)

    if resident:
        grid = (gm,)
        in_specs = [
            # Streamed activation tile (partial last block masked by Pallas).
            pl.BlockSpec((tm, D), lambda i: (i, 0)),
            # Fused weight: resident across the whole M axis, single buffer.
            _resident_weight_spec((D, n_pad), lambda i: (0, 0)),
        ]
        out_specs = pl.BlockSpec((tm, n_pad), lambda i: (i, 0))
        dim_sem = ("parallel",)
    else:
        gn = pl.cdiv(n_pad, tn)
        # N outermost: each weight column-block is DMA'd once and stays resident
        # across the inner M sweep; x is re-streamed gn times (gn > 1 only when
        # the fused weight exceeds the VMEM budget, e.g. v7x + very large H*C).
        grid = (gn, gm)
        in_specs = [
            pl.BlockSpec((tm, D), lambda j, i: (i, 0)),
            pl.BlockSpec((D, tn), lambda j, i: (0, j)),
        ]
        out_specs = pl.BlockSpec((tm, tn), lambda j, i: (i, j))
        dim_sem = ("parallel", "parallel")

    out = pl.pallas_call(
        _action_head_kernel,
        out_shape=jax.ShapeDtypeStruct((M, n_pad), out_dtype),
        grid_spec=pltpu.PrefetchScalarGridSpec(
            num_scalar_prefetch=0,
            grid=grid,
            in_specs=in_specs,
            out_specs=out_specs,
        ),
        compiler_params=pltpu.CompilerParams(
            dimension_semantics=dim_sem,
            vmem_limit_bytes=vmem_limit,
        ),
    )(x2d, w_fused)

    # When n_pad == n_out the column slice is a no-op and the reshape is
    # zero-copy; otherwise the slice is one extra pass over the logits.
    # TODO(synk): fuse the downstream consumer (softmax / CE loss) into the
    # kernel so padded columns never round-trip through HBM.
    logits = out[:, :n_out].reshape(B, T, num_heads, nclasses)
    if num_heads == 1:
        logits = logits[:, :, 0, :]  # (B, T, C): single-head branch
    return logits


def init_action_head_params(key, actions_info, n_embd):
    """Deterministic init mirroring nn.Linear(n_embd, nclasses, bias=False).

    Each PyTorch weight is (nclasses, n_embd); stored pre-transposed as
    (n_embd, nclasses) and stacked over heads -> (H, n_embd, nclasses).
    """
    nclasses = actions_info[0].nclasses
    assert all(a.nclasses == nclasses for a in actions_info), (
        "torch.stack in the reference requires all heads to share nclasses"
    )
    bound = 1.0 / (n_embd ** 0.5)
    ws = []
    for i, _ in enumerate(actions_info):
        k = jax.random.fold_in(key, i)
        w = jax.random.uniform(
            k, (nclasses, n_embd), jnp.float32, minval=-bound, maxval=bound
        )
        ws.append(w.T)  # (n_embd, nclasses)
    return jnp.stack(ws, axis=0)  # (H, n_embd, nclasses)


def reference_forward(x, w_stacked, compute_dtype=jnp.bfloat16):
    """Pure-JAX reference replicating the PyTorch semantics with the same
    bf16-operand / f32-accumulation numerics as the kernel."""
    H = w_stacked.shape[0]
    xb = x.astype(compute_dtype)
    wb = w_stacked.astype(compute_dtype)
    outs = [
        jnp.einsum("btd,dc->btc", xb, wb[h],
                   preferred_element_type=jnp.float32)
        for h in range(H)
    ]
    if H == 1:
        return outs[0]
    return jnp.stack(outs, axis=2)


if __name__ == "__main__":
    # Small shapes consistent with the module: (B, T, n_embd) token features.
    B, T, n_embd = 2, 8, 32
    actions_info = [ActionInfo(nclasses=16) for _ in range(3)]  # 3 heads

    key = jax.random.PRNGKey(0)
    kx, kw = jax.random.split(key)
    x = jax.random.normal(kx, (B, T, n_embd), jnp.float32)
    w_stacked = init_action_head_params(kw, actions_info, n_embd)

    # Weight fusion / padding / cast is hoisted out of forward: paid once here.
    w_fused, H, C = prepare_fused_weight(w_stacked)
    w_fused = jax.block_until_ready(w_fused)

    out = jax.block_until_ready(
        action_head_forward(x, w_fused, num_heads=H, nclasses=C))
    ref = jax.block_until_ready(reference_forward(x, w_stacked))

    assert out.shape == (B, T, len(actions_info), actions_info[0].nclasses)
    assert jnp.allclose(out, ref, atol=1e-2, rtol=1e-2), (
        float(jnp.max(jnp.abs(out - ref)))
    )

    # Also exercise the single-head branch (returns (B, T, C), no head axis).
    single_info = [ActionInfo(nclasses=16)]
    w_single = init_action_head_params(kw, single_info, n_embd)
    w1_fused, H1, C1 = prepare_fused_weight(w_single)
    out1 = jax.block_until_ready(
        action_head_forward(x, w1_fused, num_heads=H1, nclasses=C1))
    ref1 = jax.block_until_ready(reference_forward(x, w_single))
    assert out1.shape == (B, T, 16)
    assert jnp.allclose(out1, ref1, atol=1e-2, rtol=1e-2), (
        float(jnp.max(jnp.abs(out1 - ref1)))
    )

    print("KERNEL_OK")
</pallas_src>

<mosaic_0001>
module attributes {stable_mosaic.version = 11 : i64} {
  func.func @_action_head_kernel(%arg0: i32, %arg1: memref<16x32xf32, #tpu.memory_space<vmem>>, %arg2: memref<32x128xbf16, #tpu.memory_space<vmem>>, %arg3: memref<16x128xf32, #tpu.memory_space<vmem>>) attributes {dimension_semantics = [#tpu.dimension_semantics<parallel>], iteration_bounds = array<i64: 1>, scalar_prefetch = 0 : i64, scratch_operands = 0 : i64, tpu.core_type = #tpu.core_type<tc>, window_params = [{transform_indices = @transform_0, window_bounds = array<i64: 16, 32>}, {pipeline_mode = #tpu.pipeline_mode<synchronous>, transform_indices = @transform_1, window_bounds = array<i64: 32, 128>}, {transform_indices = @transform_2, window_bounds = array<i64: 16, 128>}]} {
    %c0 = arith.constant 0 : index
    %c0_0 = arith.constant 0 : index
    %0 = vector.load %arg1[%c0, %c0_0] : memref<16x32xf32, #tpu.memory_space<vmem>>, vector<16x32xf32>
    %1 = arith.truncf %0 : vector<16x32xf32> to vector<16x32xbf16>
    %c0_1 = arith.constant 0 : index
    %c0_2 = arith.constant 0 : index
    %2 = vector.load %arg2[%c0_1, %c0_2] : memref<32x128xbf16, #tpu.memory_space<vmem>>, vector<32x128xbf16>
    %cst = arith.constant dense<0.000000e+00> : vector<16x128xf32>
    %3 = tpu.matmul %1, %2, %cst {dimension_numbers = #tpu.dot_dimension_numbers<[1], [0], [0], [1], [0, 0, 1, 1], [], []>} : vector<16x32xbf16>, vector<32x128xbf16>, vector<16x128xf32> -> vector<16x128xf32>
    %c0_3 = arith.constant 0 : index
    %c0_4 = arith.constant 0 : index
    %4 = vector.load %arg3[%c0_3, %c0_4] : memref<16x128xf32, #tpu.memory_space<vmem>>, vector<16x128xf32>
    tpu.vector_store %arg3[%c0_3, %c0_4], %3 {strides = array<i32>} : memref<16x128xf32, #tpu.memory_space<vmem>>, vector<16x128xf32>,
    return
  }
  func.func @transform_0(%arg0: i32) -> (i32, i32) {
    %c0_i32 = arith.constant 0 : i32
    %c0_i32_0 = arith.constant 0 : i32
    return %arg0, %c0_i32 : i32, i32
  }
  func.func @transform_1(%arg0: i32) -> (i32, i32) {
    %c0_i32 = arith.constant 0 : i32
    %c0_i32_0 = arith.constant 0 : i32
    %c0_i32_1 = arith.constant 0 : i32
    return %c0_i32, %c0_i32_0 : i32, i32
  }
  func.func @transform_2(%arg0: i32) -> (i32, i32) {
    %c0_i32 = arith.constant 0 : i32
    %c0_i32_0 = arith.constant 0 : i32
    return %arg0, %c0_i32 : i32, i32
  }
}

</mosaic_0001>

<bundles_post_ra>
// kernel: tpu_custom_call.1
= control target key start
LH: loop header
LB: loop body
LE: loop exit
PB: predicated region body
PF: predicated region fallthrough
CT: control target
= control target key end

     0   :  { %7 = vsyncpa [#allocation3], 0  ;;  %s237_s0 = inlined_call_operand.hbm [shape: f32[16,32], index: 0, kind: input, shape index: {}]   ;;  %s238_s1 = inlined_call_operand.hbm [shape: bf16[32,128], index: 1, kind: input, shape index: {}]   ;;  %s239_s2 = inlined_call_operand.hbm [shape: f32[16,128], index: 2, kind: output, shape index: {}]  }
   0x1   :  { %8 = vsyncpa [#allocation6], 0 }
   0x2   :  { %9 = vsyncpa [#allocation4], 0  ;;  %s14_s11 = sshll.u32 %s237_s0, 4  ;;  %s200_s12 = smov [#allocation2]   ;;  %s15_s11 = int_to_ptr.hbm [resolvable:$true] %s14_s11 }
   0x3   :  { %s16_s13 = sshll.u32 %s200_s12, 4  ;;  %s27_s16 = sshll.u32 %s238_s1, 4  ;;  %s17_s13 = int_to_ptr.vmem [resolvable:$true] %s16_s13  ;;  %s28_s16 = int_to_ptr.hbm [resolvable:$true] %s27_s16 }
   0x4   :  { %s201_s17 = smov 128   ;;  %s202_s18 = smov 8  }
   0x5   :  { %22 = dma.hbm_to_vmem [thread:$0]  %s15_s11, 256, %s17_s13, [#allocation3], %s201_s17, %s201_s17, %s202_s18  }
   0x6   :  { %s203_s19 = smov [#allocation5]   ;;  %s204_s21 = smov 64  }
   0x7   :  { %s29_s20 = sshll.u32 %s203_s19, 4  ;;  %s205_s0 = smov 4   ;;  %s30_s20 = int_to_ptr.vmem [resolvable:$true] %s29_s20 }
   0x8   :  { %35 = dma.hbm_to_vmem [thread:$0]  %s28_s16, 256, %s30_s20, [#allocation6], %s204_s21, %s204_s21, %s205_s0  }
   0x9   :  { %194 = dma.done.wait [#allocation3], 256  }
   0xa   :  { %195 = vsyncadd [#allocation3], 4294967040 }
   0xb   :  { %196 = dma.done.wait [#allocation6], 256  }
   0xc   :  { %197 = vsyncadd [#allocation6], 4294967040  ;;  %v114_v0 = vld [vmem:[#allocation5 + $0x8] sm:$0xff]  ;;  %v113_v1 = vld [vmem:[#allocation5] sm:$0xff]  ;;  %vm64_vm0 = vcmask 261120   ;;  %s206_s1 = smov [#allocation7]  }
   0xd   :  { %74 = vmatpush.bf16.msra.mxu0 %v114_v0  ;;  %v45_v2 = vld [vmem:[#allocation2] sm:$0xff]  ;;  %v46_v3 = vld [vmem:[#allocation2 + $0x8] sm:$0xff]  ;;  %s88_s22 = sshll.u32 %s206_s1, 4  ;;  %s90_s25 = sshll.u32 %s239_s2, 4  ;;  %s89_s22 = int_to_ptr.vmem [resolvable:$true] %s88_s22  ;;  %s91_s25 = int_to_ptr.hbm [resolvable:$true] %s90_s25 }
   0xe   :  { %v47_v4 = vpack.c.bf16 %v46_v3, %v45_v2 }
  0x11   :  { %75 = vmatpush.bf16.msra.mxu0 %v113_v1 }
  0x14   :  { %112 = vmatmul.msk.bf16.vlgmr.msra.gmra.mxu0 %vm64_vm0, %v47_v4 }
  0x91   :  { %v77_v5 = vpop.f32.mrf.mxu0 }
  0x92   :  { %82 = vst [vmem:[#allocation7] sm:$0xff] %v77_v5 }
  0x99   :  { %v79_v6 = vpop.f32.mrf.mxu0 }
  0x9a   :  { %83 = vst [vmem:[#allocation7 + $0x8] sm:$0xff] %v79_v6 }
  0x9b   :  { %96 = dma.vmem_to_hbm [thread:$0]  %s89_s22, 256, %s91_s25, [#allocation4], %s201_s17, %s201_s17, %s202_s18  }
  0x9c   :  { %198 = dma.done.wait [#allocation4], 256  }
  0x9d   :  { %199 = vsyncadd [#allocation4], 4294967040 }
  0x9e   :  { %101 = vsyncpa [#allocation3], 1 }
  0x9f   :  { %102 = vsyncpa [#allocation6], 1 }
  0xa0   :  { %103 = vsyncpa [#allocation4], 1 }

</bundles_post_ra>
